<compile_context>
chip_gen: v6e
topology: v6e:2x2x1
jax: 0.10.0
libtpu: 0.0.40
codegen_flags: <defaults>
</compile_context>

<pallas_src>
import functools

import jax
import jax.numpy as jnp
from jax.experimental import pallas as pl
from jax.experimental.pallas import tpu as pltpu

_BN_EPS = 1e-5


def _bottleblock_kernel(x_ref, w_ref, b_ref, out_ref, *, matmul_dtype):
    """One row-tile of the fused bottleneck block.

    x_ref:   (TM, Cp)     pixel tile, channels-last, lane-packed, bf16
    w_ref:   (3, Cp, Cp)  BN-folded (block-diagonal) 1x1 conv weights, matmul_dtype
    b_ref:   (3, Cp)      BN-folded biases, f32
    out_ref: (TM, Cp)     bf16
    """
    x = x_ref[...]                                   # bf16 tile (no upcast for matmul)
    b = b_ref[...]                                   # (3, Cp) f32

    # conv1 (1x1) + bn1 folded -> relu
    h = jnp.dot(x.astype(matmul_dtype), w_ref[0],
                preferred_element_type=jnp.float32) + b[0:1, :]
    h = jnp.maximum(h, 0.0)

    # conv2 (1x1, default conv_fsize=(1,1), stride=1) + bn2 folded -> relu
    h = jnp.dot(h.astype(matmul_dtype), w_ref[1],
                preferred_element_type=jnp.float32) + b[1:2, :]
    h = jnp.maximum(h, 0.0)

    # conv3 (1x1) + bn3 folded
    h = jnp.dot(h.astype(matmul_dtype), w_ref[2],
                preferred_element_type=jnp.float32) + b[2:3, :]

    # residual add (short=None -> residual = x) + final relu; f32 math, bf16 store
    out_ref[...] = jnp.maximum(h + x.astype(jnp.float32), 0.0).astype(out_ref.dtype)


def _round_up(x, m):
    return ((x + m - 1) // m) * m


def _pick_channel_pad(c, lane_width=128):
    """Zero-pad channel count so the packed lane width is a multiple of 128."""
    if c >= lane_width:
        return _round_up(c, lane_width), 1
    c_pad = 1
    while c_pad < c:                       # smallest power-of-two divisor of 128 >= c
        c_pad *= 2
    return c_pad, lane_width // c_pad


def _choose_tile_rows(mp_rows, target=1024, min_steps=4, row_align=16):
    """Fixed-size row tile (pad-to-tile): <= target rows, aligned to row_align, and
    giving >= min_steps grid steps (>= 2 per TensorCore on v7x) when mp_rows allows."""
    if mp_rows <= row_align:
        return row_align
    tile = min(target, _round_up(pl.cdiv(mp_rows, min_steps), row_align))
    return max(tile, row_align)


def fold_and_pack_params(raw_params, c_pad, pack, matmul_dtype, eps=_BN_EPS):
    """Fold eval-mode BN + conv bias into the conv weights, zero-pad channels to
    c_pad, build block-diagonal lane-packed weights, and stack the three layers."""
    ws, bs = [], []
    for (w_oihw, bias, gamma, beta, mean, var) in raw_params:
        c_out, c_in = w_oihw.shape[0], w_oihw.shape[1]
        w = w_oihw.reshape(c_out, c_in).T                    # (Cin, Cout)
        scale = gamma / jnp.sqrt(var + eps)                  # (C,)
        shift = beta - mean * scale
        w_f = w * scale[None, :]                             # fold BN scale
        b_f = bias * scale + shift                           # fold bias + BN shift
        if c_pad > c_in or c_pad > c_out:                    # channel padding fallback
            w_f = jnp.zeros((c_pad, c_pad), w_f.dtype).at[:c_in, :c_out].set(w_f)
            b_f = jnp.zeros((c_pad,), b_f.dtype).at[:c_out].set(b_f)
        if pack > 1:
            w_f = jnp.kron(jnp.eye(pack, dtype=w_f.dtype), w_f)   # block-diagonal
            b_f = jnp.tile(b_f, pack)
        ws.append(w_f.astype(matmul_dtype))
        bs.append(b_f.astype(jnp.float32))
    return jnp.stack(ws), jnp.stack(bs)                      # (3,Cp,Cp), (3,Cp)


def bottleblock_pallas_slab(x2d, w_stack, b_stack, *, matmul_dtype=jnp.bfloat16,
                            target_tile_rows=1024):
    """Fused block on a channels-last, lane-packed (Mp, Cp) bf16 slab.

    In a full network, keep activations in this layout (and dtype) end-to-end so the
    NCHW<->NHWC HBM round trips in the wrapper below disappear."""
    mp, cp = x2d.shape
    assert w_stack.shape == (3, cp, cp) and b_stack.shape == (3, cp)

    row_align = 16 if jnp.dtype(x2d.dtype).itemsize == 2 else 8
    tile_rows = _choose_tile_rows(mp, target=target_tile_rows,
                                  min_steps=4, row_align=row_align)
    mp_pad = _round_up(mp, tile_rows)
    x_in = jnp.pad(x2d, ((0, mp_pad - mp), (0, 0))) if mp_pad != mp else x2d
    grid = (mp_pad // tile_rows,)

    row_spec = pl.BlockSpec((tile_rows, cp), lambda i: (i, 0))

    # Weights/bias have a constant index_map (fetched once); single-buffer them once
    # they get large so whole-weight residency doesn't force tiny row tiles — matters
    # most on v7x (64 MiB physical / 32 MiB default-scoped VMEM).
    # TODO(synk): for Cp >= ~1024 (v7x) / ~2048 (v5e/v6e) switch to a K/Cout grid axis
    #             with an f32 accumulator instead of whole-weight residency.
    if cp >= 512:
        w_spec = pl.BlockSpec((3, cp, cp), lambda i: (0, 0, 0),
                              pipeline_mode=pl.Buffered(1))
        b_spec = pl.BlockSpec((3, cp), lambda i: (0, 0),
                              pipeline_mode=pl.Buffered(1))
        w_bufs = 1
    else:
        w_spec = pl.BlockSpec((3, cp, cp), lambda i: (0, 0, 0))
        b_spec = pl.BlockSpec((3, cp), lambda i: (0, 0))
        w_bufs = 2

    act_bytes = jnp.dtype(x_in.dtype).itemsize
    w_bytes = jnp.dtype(w_stack.dtype).itemsize
    tile_elems = tile_rows * cp
    vmem_est = (2 * 2 * tile_elems * act_bytes            # in + out tiles, double-buffered
                + w_bufs * 3 * cp * cp * w_bytes           # resident weights
                + 2 * 3 * cp * 4                           # biases
                + 4 * tile_elems * 4                       # f32 intermediates headroom
                + (2 << 20))
    vmem_limit = int(min(48 << 20, max(vmem_est, 32 << 20)))

    out2d = pl.pallas_call(
        functools.partial(_bottleblock_kernel, matmul_dtype=matmul_dtype),
        out_shape=jax.ShapeDtypeStruct((mp_pad, cp), x_in.dtype),
        grid_spec=pltpu.PrefetchScalarGridSpec(
            num_scalar_prefetch=0,
            grid=grid,
            in_specs=[row_spec, w_spec, b_spec],
            out_specs=row_spec,
        ),
        # Each tile reads its x rows (residual) before writing the same rows back:
        # safe to reuse the activation buffer for the output.
        input_output_aliases={0: 0},
        compiler_params=pltpu.CompilerParams(
            dimension_semantics=("parallel",),
            vmem_limit_bytes=vmem_limit),
    )(x_in, w_stack, b_stack)

    return out2d if mp_pad == mp else out2d[:mp]


def bottleblock_pallas(x_nchw, raw_params, *, matmul_dtype=jnp.bfloat16,
                       lane_width=128, target_tile_rows=1024):
    """Run BottleBlock (default 1x1/stride-1/identity-shortcut config) on an NCHW
    input using the fused Pallas kernel.  Output dtype matches the input dtype.

    TODO(synk): in a full network keep activations channels-last bf16 end-to-end
    (use bottleblock_pallas_slab directly) — the NCHW<->NHWC + dtype conversion
    round trips here roughly triple HBM traffic for a single mem-bound block."""
    N, C, H, W = x_nchw.shape
    M = N * H * W

    c_pad, pack = _pick_channel_pad(C, lane_width)
    cp = c_pad * pack

    w_stack, b_stack = fold_and_pack_params(raw_params, c_pad, pack, matmul_dtype)

    # NCHW -> NHWC -> (M, C) bf16, channel-pad, pixel-pad to a multiple of `pack`,
    # then lane-pack `pack` pixels per row -> (Mp, Cp) slab.
    x_flat = jnp.transpose(x_nchw, (0, 2, 3, 1)).reshape(M, C).astype(matmul_dtype)
    if c_pad > C:
        x_flat = jnp.pad(x_flat, ((0, 0), (0, c_pad - C)))
    m_pix_pad = _round_up(M, pack)
    if m_pix_pad > M:
        x_flat = jnp.pad(x_flat, ((0, m_pix_pad - M), (0, 0)))
    x2d = x_flat.reshape(m_pix_pad // pack, cp)

    out2d = bottleblock_pallas_slab(x2d, w_stack, b_stack,
                                    matmul_dtype=matmul_dtype,
                                    target_tile_rows=target_tile_rows)

    out = out2d.reshape(m_pix_pad, c_pad)[:M, :C]
    return jnp.transpose(out.reshape(N, H, W, C), (0, 3, 1, 2)).astype(x_nchw.dtype)


def make_params(key, channels):
    """Deterministic synthetic parameters mimicking the PyTorch module:
    three (conv1x1 weight, conv bias, BN gamma, BN beta, running_mean, running_var)."""
    C = channels
    raw = []
    ks = jax.random.split(key, 18)
    for layer in range(3):
        kw, kb, kg, kbe, km, kv = ks[layer * 6:(layer + 1) * 6]
        w = jax.random.normal(kw, (C, C, 1, 1), jnp.float32) * 0.1   # (Cout,Cin,1,1)
        b = jax.random.normal(kb, (C,), jnp.float32) * 0.1
        gamma = 1.0 + 0.1 * jax.random.normal(kg, (C,), jnp.float32)
        beta = 0.1 * jax.random.normal(kbe, (C,), jnp.float32)
        mean = 0.1 * jax.random.normal(km, (C,), jnp.float32)
        var = jnp.abs(1.0 + 0.1 * jax.random.normal(kv, (C,), jnp.float32))
        raw.append((w, b, gamma, beta, mean, var))
    return raw


def bottleblock_ref(x_nchw, raw_params, eps=_BN_EPS):
    """Pure-JAX f32 reference (eval-mode BN), NCHW in/out."""
    N, C, H, W = x_nchw.shape
    x = jnp.transpose(x_nchw, (0, 2, 3, 1)).reshape(-1, C).astype(jnp.float32)
    h = x
    for layer, (w_oihw, b, gamma, beta, mean, var) in enumerate(raw_params):
        w = w_oihw.reshape(w_oihw.shape[0], w_oihw.shape[1]).T
        h = h @ w + b
        scale = gamma / jnp.sqrt(var + eps)
        h = h * scale + (beta - mean * scale)
        if layer < 2:
            h = jnp.maximum(h, 0.0)
    out = jnp.maximum(h + x, 0.0)
    return jnp.transpose(out.reshape(N, H, W, C), (0, 3, 1, 2))


if __name__ == "__main__":
    key = jax.random.PRNGKey(0)
    kx, kp = jax.random.split(key)

    N, C, H, W = 2, 32, 16, 16          # short=None => in_channel == out_channel
    x = jax.random.normal(kx, (N, C, H, W), jnp.float32)
    raw_params = make_params(kp, C)

    out = bottleblock_pallas(x, raw_params)
    out = jax.block_until_ready(out)

    ref = bottleblock_ref(x, raw_params)
    assert out.shape == (N, C, H, W)
    max_err = float(jnp.max(jnp.abs(out - ref)))
    # bf16 activations + bf16 weights (f32 MXU accumulation) vs f32 reference:
    # error is dominated by bf16 quantization of x / out (|x| up to ~4 -> ~2e-2),
    # so use a correspondingly loose absolute tolerance.
    assert max_err < 1e-1, f"max abs error {max_err}"

    print("KERNEL_OK")
</pallas_src>

<mosaic_0001>
module attributes {stable_mosaic.version = 11 : i64} {
  func.func @_bottleblock_kernel(%arg0: i32, %arg1: memref<32x128xbf16, #tpu.memory_space<vmem>>, %arg2: memref<3x128x128xbf16, #tpu.memory_space<vmem>>, %arg3: memref<3x128xf32, #tpu.memory_space<vmem>>, %arg4: memref<32x128xbf16, #tpu.memory_space<vmem>>) attributes {dimension_semantics = [#tpu.dimension_semantics<parallel>], iteration_bounds = array<i64: 4>, scalar_prefetch = 0 : i64, scratch_operands = 0 : i64, tpu.core_type = #tpu.core_type<tc>, window_params = [{transform_indices = @transform_0, window_bounds = array<i64: 32, 128>}, {pipeline_mode = #tpu.pipeline_mode<synchronous>, transform_indices = @transform_1, window_bounds = array<i64: 3, 128, 128>}, {pipeline_mode = #tpu.pipeline_mode<synchronous>, transform_indices = @transform_2, window_bounds = array<i64: 3, 128>}, {transform_indices = @transform_3, window_bounds = array<i64: 32, 128>}]} {
    %c0 = arith.constant 0 : index
    %c0_0 = arith.constant 0 : index
    %0 = vector.load %arg1[%c0, %c0_0] : memref<32x128xbf16, #tpu.memory_space<vmem>>, vector<32x128xbf16>
    %c0_1 = arith.constant 0 : index
    %c0_2 = arith.constant 0 : index
    %1 = vector.load %arg3[%c0_1, %c0_2] : memref<3x128xf32, #tpu.memory_space<vmem>>, vector<3x128xf32>
    %c0_3 = arith.constant 0 : index
    %c0_4 = arith.constant 0 : index
    %c0_5 = arith.constant 0 : index
    %2 = vector.load %arg2[%c0_3, %c0_4, %c0_5] : memref<3x128x128xbf16, #tpu.memory_space<vmem>>, vector<1x128x128xbf16>
    %3 = vector.shape_cast %2 : vector<1x128x128xbf16> to vector<128x128xbf16>
    %cst = arith.constant dense<0.000000e+00> : vector<32x128xf32>
    %4 = tpu.matmul %0, %3, %cst {dimension_numbers = #tpu.dot_dimension_numbers<[1], [0], [0], [1], [0, 0, 1, 1], [], []>} : vector<32x128xbf16>, vector<128x128xbf16>, vector<32x128xf32> -> vector<32x128xf32>
    %5 = vector.extract_strided_slice %1 {offsets = [0, 0], sizes = [1, 128], strides = [1, 1]} : vector<3x128xf32> to vector<1x128xf32>
    %6 = vector.broadcast %5 : vector<1x128xf32> to vector<32x128xf32>
    %7 = arith.addf %4, %6 : vector<32x128xf32>
    %cst_6 = arith.constant 0.000000e+00 : f32
    %8 = vector.broadcast %cst_6 : f32 to vector<32x128xf32>
    %9 = arith.maximumf %7, %8 : vector<32x128xf32>
    %10 = arith.truncf %9 : vector<32x128xf32> to vector<32x128xbf16>
    %c1 = arith.constant 1 : index
    %c0_7 = arith.constant 0 : index
    %c0_8 = arith.constant 0 : index
    %11 = vector.load %arg2[%c1, %c0_7, %c0_8] : memref<3x128x128xbf16, #tpu.memory_space<vmem>>, vector<1x128x128xbf16>
    %12 = vector.shape_cast %11 : vector<1x128x128xbf16> to vector<128x128xbf16>
    %cst_9 = arith.constant dense<0.000000e+00> : vector<32x128xf32>
    %13 = tpu.matmul %10, %12, %cst_9 {dimension_numbers = #tpu.dot_dimension_numbers<[1], [0], [0], [1], [0, 0, 1, 1], [], []>} : vector<32x128xbf16>, vector<128x128xbf16>, vector<32x128xf32> -> vector<32x128xf32>
    %14 = vector.extract_strided_slice %1 {offsets = [1, 0], sizes = [1, 128], strides = [1, 1]} : vector<3x128xf32> to vector<1x128xf32>
    %15 = vector.broadcast %14 : vector<1x128xf32> to vector<32x128xf32>
    %16 = arith.addf %13, %15 : vector<32x128xf32>
    %cst_10 = arith.constant 0.000000e+00 : f32
    %17 = vector.broadcast %cst_10 : f32 to vector<32x128xf32>
    %18 = arith.maximumf %16, %17 : vector<32x128xf32>
    %19 = arith.truncf %18 : vector<32x128xf32> to vector<32x128xbf16>
    %c2 = arith.constant 2 : index
    %c0_11 = arith.constant 0 : index
    %c0_12 = arith.constant 0 : index
    %20 = vector.load %arg2[%c2, %c0_11, %c0_12] : memref<3x128x128xbf16, #tpu.memory_space<vmem>>, vector<1x128x128xbf16>
    %21 = vector.shape_cast %20 : vector<1x128x128xbf16> to vector<128x128xbf16>
    %cst_13 = arith.constant dense<0.000000e+00> : vector<32x128xf32>
    %22 = tpu.matmul %19, %21, %cst_13 {dimension_numbers = #tpu.dot_dimension_numbers<[1], [0], [0], [1], [0, 0, 1, 1], [], []>} : vector<32x128xbf16>, vector<128x128xbf16>, vector<32x128xf32> -> vector<32x128xf32>
    %23 = vector.extract_strided_slice %1 {offsets = [2, 0], sizes = [1, 128], strides = [1, 1]} : vector<3x128xf32> to vector<1x128xf32>
    %24 = vector.broadcast %23 : vector<1x128xf32> to vector<32x128xf32>
    %25 = arith.addf %22, %24 : vector<32x128xf32>
    %26 = arith.extf %0 : vector<32x128xbf16> to vector<32x128xf32>
    %27 = arith.addf %25, %26 : vector<32x128xf32>
    %cst_14 = arith.constant 0.000000e+00 : f32
    %28 = vector.broadcast %cst_14 : f32 to vector<32x128xf32>
    %29 = arith.maximumf %27, %28 : vector<32x128xf32>
    %30 = arith.truncf %29 : vector<32x128xf32> to vector<32x128xbf16>
    %c0_15 = arith.constant 0 : index
    %c0_16 = arith.constant 0 : index
    %31 = vector.load %arg4[%c0_15, %c0_16] : memref<32x128xbf16, #tpu.memory_space<vmem>>, vector<32x128xbf16>
    tpu.vector_store %arg4[%c0_15, %c0_16], %30 {strides = array<i32>} : memref<32x128xbf16, #tpu.memory_space<vmem>>, vector<32x128xbf16>,
    return
  }
  func.func @transform_0(%arg0: i32) -> (i32, i32) {
    %c0_i32 = arith.constant 0 : i32
    %c0_i32_0 = arith.constant 0 : i32
    return %arg0, %c0_i32 : i32, i32
  }
  func.func @transform_1(%arg0: i32) -> (i32, i32, i32) {
    %c0_i32 = arith.constant 0 : i32
    %c0_i32_0 = arith.constant 0 : i32
    %c0_i32_1 = arith.constant 0 : i32
    %c0_i32_2 = arith.constant 0 : i32
    return %c0_i32, %c0_i32_0, %c0_i32_1 : i32, i32, i32
  }
  func.func @transform_2(%arg0: i32) -> (i32, i32) {
    %c0_i32 = arith.constant 0 : i32
    %c0_i32_0 = arith.constant 0 : i32
    %c0_i32_1 = arith.constant 0 : i32
    return %c0_i32, %c0_i32_0 : i32, i32
  }
  func.func @transform_3(%arg0: i32) -> (i32, i32) {
    %c0_i32 = arith.constant 0 : i32
    %c0_i32_0 = arith.constant 0 : i32
    return %arg0, %c0_i32 : i32, i32
  }
}

</mosaic_0001>

<bundles_post_ra>
// kernel: tpu_custom_call.1
= control target key start
LH: loop header
LB: loop body
LE: loop exit
PB: predicated region body
PF: predicated region fallthrough
CT: control target
= control target key end

     0   :  { %8 = vsyncpa [#allocation3], 0  ;;  %s1313_s0 = inlined_call_operand.hbm [shape: bf16[128,128], index: 0, kind: input, shape index: {}, may-alias: {0,3}]   ;;  %s1314_s1 = inlined_call_operand.hbm [shape: bf16[3,128,128], index: 1, kind: input, shape index: {}]   ;;  %s1315_s2 = inlined_call_operand.vmem [shape: f32[3,128], index: 2, kind: input, shape index: {}]   ;;  %s1316_s3 = inlined_call_operand.hbm [shape: bf16[128,128], index: 3, kind: output, shape index: {}, may-alias: {0,3}]  }
   0x1   :  { %10 = vsyncpa [#allocation3 + $0x1], 0 }
   0x2   :  { %11 = vsyncpa [#allocation6], 0 }
   0x3   :  { %12 = vsyncpa [#allocation4], 0 }
   0x4   :  { %14 = vsyncpa [#allocation4 + $0x1], 0  ;;  %s1111_s12 = smov 0   ;;  %s1113_s13 = smov 0  }
   0x5   :  { %s1115_s14 = smov 0   ;;  %s1117_s15 = smov 0  }
   0x6 LB: > { %s1132_s16 = sadd.s32 4294967295, %s1082_s15   ;;  %s718_s17 = sadd.s32 4294967294, %s1082_s15   ;;  %s1082_s15 = sphi %s1117_s15, %s1337_s15   ;;  %s1078_s14 = sphi %s1115_s14, %s1336_s14   ;;  %s1074_s13 = sphi %s1113_s13, %s1335_s13   ;;  %s1070_s12 = sphi %s1111_s12, %s1334_s12  }
   0x7   : > { %p40_p0 = scmp.ne.s32.totalorder %s1074_s13, %s1070_s12  ;;  %p1317_p1 = scmp.eq.s32.totalorder %s1132_s16, 0 }
   0x8   : > { %p112_p3 = scmp.eq.s32.totalorder %s718_s17, 3  ;;  %p719_p5 = scmp.ge.s32.totalorder %s1082_s15, 1 }
   0x9   : > { %p1141_p4 = por %p1317_p1, %p40_p0  ;;  %p119_p7 = scmp.lt.s32.totalorder %s1082_s15, 5 }
   0xa   : > { %p1146_p6 = por %p112_p3, %p40_p0  ;;  %s1084_s21 = smov [#allocation5]  }
   0xb   : > { %s1321_s18 = scalar_select %p1141_p4, 1, 0 }
   0xc   : > { %s1322_s19 = scalar_select %p1146_p6, 1, 0 }
   0xd   : > { %p1151_p8 = pnand %p719_p5, %p119_p7  ;;  %s131_s22 = sshll.u32 %s1084_s21, 4  ;;  %s132_s22 = int_to_ptr.vmem [resolvable:$true] %s131_s22 }
   0xe   : > { %s1164_s24 = sadd.s32 1, %s1082_s15   ;;  %s27_s25 = sadd.s32 1, %s1078_s14 }
   0xf   : > { %s1323_s20 = scalar_select %p1151_p8, 1, 0 }
  0x10   : > { %p879_p9 = pneg %p1151_p8  ;;  %s24_s26 = ssub.s32 %s1082_s15, %s1164_s24 }
  0x11   : > { %s971_s27 = scalar_lea.vmem %s132_s22, 3072  ;;  %p979_p3 = scmp.lt.s32.totalorder %s132_s22, %s132_s22 }
  0x12   : > { %p1159_p10 = pnand %p879_p9, %p1317_p1  ;;  %p972_p12 = scmp.ne.s32.totalorder %s132_s22, %s971_s27 }
  0x13   : > { %p980_p5 = scmp.lt.s32.totalorder %s971_s27, %s971_s27 }
  0x14   : > { %p962_p11 = pneg %p1159_p10 }
  0x15   : > { %p981_p7 = por %p980_p5, %p979_p3 }
  0x16   : > { %p974_p13 = pnand %p972_p12, %p962_p11 }
  0x18   : > { %p975_p0 = pneg %p974_p13 }
  0x1a   : > { %p982_p2 = pnand %p981_p7, %p975_p0 }
  0x1c   : > { %985 = shalt.err (!%p982_p2)
}
  0x1d   : > { %s1085_s28 = smov 64   ;;  %s1086_s29 = smov 4  }
  0x1e   : > { %882 = dma.hbm_to_vmem [thread:$0]  (!%p1159_p10), %s1314_s1, 3072, %s132_s22, [#allocation6], %s1085_s28, %s1085_s28, %s1086_s29  }
  0x1f   : > { %p25_p2 = scmp.eq.s32.totalorder %s24_s26, 0  ;;  %p34_p9 = scmp.ne.s32.totalorder %s1078_s14, %s1074_s13 }
  0x20   : > { %p35_p11 = scmp.eq.s32.totalorder %s1082_s15, 0  ;;  %p892_p12 = scmp.lt.s32.totalorder %s1082_s15, 4 }
  0x21   : > { %s1184_s5 = scalar_select %p25_p2, %s1078_s14, %s27_s25  }
  0x22   : > { %p36_p13 = por %p35_p11, %p34_p9  ;;  %p1325_p0 = scmp.eq.s32.totalorder %s1132_s16, 3 }
  0x23   : > { %s148_s7 = sand.u32 1, %s1078_s14   ;;  %s764_s8 = sshll.u32 %s1082_s15, 8 }
  0x24   : > { %p1188_p3 = por %p1325_p0, %p34_p9  ;;  %s722_s9 = sshll.u32 %s148_s7, 4 }
  0x25   : > { %s1197_s17 = scalar_lea.hbm %s1313_s0, %s764_s8  ;;  %s152_s21 = scalar_lea.vmem [#allocation2], %s722_s9 }
  0x26   : > { %s1326_s6 = scalar_select %p1188_p3, 1, 0 }
  0x27   : > { %s159_s22 = sshll.u32 %s152_s21, 4  ;;  %p1199_p10 = pnand %p892_p12, %p36_p13  ;;  %s1203_s22 = int_to_ptr.vmem [resolvable:$true] %s159_s22 }
  0x28   : > { %s1205_s25 = scalar_lea.sflag [#allocation3], %s148_s7  ;;  %s986_s26 = scalar_lea.hbm %s1197_s17, 256 }
  0x29   : > { %p987_p5 = scmp.ne.s32.totalorder %s1197_s17, %s986_s26  ;;  %p988_p7 = pneg %p1199_p10 }
  0x2a   : > { %s991_s4 = scalar_lea.hbm %s1313_s0, 1024  ;;  %p992_p11 = scmp.lt.s32.totalorder %s1197_s17, %s1313_s0 }
  0x2b   : > { %p989_p2 = pnand %p988_p7, %p987_p5  ;;  %p993_p12 = scmp.lt.s32.totalorder %s991_s4, %s986_s26 }
  0x2d   : > { %p990_p9 = pneg %p989_p2  ;;  %p994_p13 = por %p993_p12, %p992_p11 }
  0x2f   : > { %p995_p0 = pnand %p994_p13, %p990_p9 }
  0x31   : > { %998 = shalt.err (!%p995_p0)
}
  0x32   : > { %s999_s7 = scalar_lea.vmem %s1203_s22, 256  ;;  %s1087_s10 = smov [#allocation2]  }
  0x33   : > { %p1000_p1 = scmp.ne.s32.totalorder %s1203_s22, %s999_s7  ;;  %s1004_s11 = sshll.u32 %s1087_s10, 4  ;;  %s1005_s11 = int_to_ptr.vmem [resolvable:$false] %s1004_s11 }
  0x34   : > { %s1006_s21 = scalar_lea.vmem %s1005_s11, 512  ;;  %p1007_p2 = scmp.lt.s32.totalorder %s1203_s22, %s1005_s11 }
  0x35   : > { %p1002_p6 = pnand %p1000_p1, %p988_p7  ;;  %p1008_p3 = scmp.lt.s32.totalorder %s1006_s21, %s999_s7 }
  0x37   : > { %p1003_p5 = pneg %p1002_p6  ;;  %p1009_p4 = por %p1008_p3, %p1007_p2 }
  0x39   : > { %p1010_p8 = pnand %p1009_p4, %p1003_p5 }
  0x3b   : > { %1013 = shalt.err (!%p1010_p8)
}
  0x3c   : > { %886 = dma.hbm_to_vmem [thread:$0]  (!%p1199_p10), %s1197_s17, 256, %s1203_s22, %s1205_s25, %s1085_s28, %s1085_s28, %s1086_s29  }
  0x3d   : > { %p1328_p1 = scmp.ne.s32.totalorder %s1323_s20, 0 }
  0x3e   : > { %s1232_s26 = sand.u32 (!%p1328_p1), 1, %s1074_s13   ;;  %p1329_p4 = scmp.ne.s32.totalorder (!%p1328_p1), %s1321_s18, 0 }
  0x3f   : > { %171 = sbr.rel (%p1328_p1) target bundleno = 738 (0x2e2), region = 32  ;;  %s726_s27 = sshll.u32 (!%p1328_p1), %s1232_s26, 4 }
  0x40   : > { %s174_s30 = scalar_lea.sflag (!%p1328_p1), [#allocation3], %s1232_s26  ;;  %s1238_s23 = scalar_lea.vmem (!%p1328_p1), [#allocation2], %s726_s27 }
  0x44   : > { %1057 = dma.done.wait (%p1329_p4), %s174_s30, 256  }
  0x45   : > { %1059 = vsyncadd (%p1329_p4), %s174_s30, 4294967040  ;;  %p1330_p6 = scmp.eq.s32.totalorder %s1132_s16, 0 }
  0x47   : > { %1061 = dma.done.wait (%p1330_p6), [#allocation6], 3072   ;;  %p1331_p8 = pmov %p1330_p6 }
  0x48   : > { %v932_v0 = vld [vmem:[#allocation5 + $0x38] sm:$0xff]   ;;  %v933_v1 = vld [vmem:[#allocation5 + $0x30] sm:$0xff]   ;;  %v934_v2 = vld [vmem:[#allocation5 + $0x28] sm:$0xff]   ;;  %v228_v23 = vlaneseq  ;;  %s203_s28 = scalar_lea.vmem [#allocation7], %s726_s27  ;;  %s769_s17 = sshll.u32 %s1132_s16, 8 }
  0x49   : > { %1063 = vsyncadd (%p1331_p8), [#allocation6], 4294964224  ;;  %811 = vmatprep.subr.bf16.mxu0 %v932_v0  ;;  %v935_v3 = vld [vmem:[#allocation5 + $0x20] sm:$0xff]   ;;  %v942_v5 = vld [vmem:[#allocation5 + $0x78] sm:$0xff]   ;;  %s635_s29 = sshll.u32 %s203_s28, 4  ;;  %s1271_s4 = scalar_lea.hbm %s1316_s3, %s769_s17  ;;  %s1266_s29 = int_to_ptr.vmem [resolvable:$true] %s635_s29 }
  0x4a   : > { %812 = vmatpush3.bf16.msra.mxu0 %v932_v0  ;;  %v1249_v4 = vld [vmem:[%s1238_s23] sm:$0xff]   ;;  %v936_v7 = vld [vmem:[#allocation5 + $0x18] sm:$0xff]   ;;  %831 = vmatprep.subr.bf16.mxu1 %v942_v5  ;;  %v944_v8 = vld [vmem:[#allocation5 + $0x68] sm:$0xff]   ;;  %v229_v24 = vshrl.u32 %v228_v23, 7  ;;  %s622_s8 = scalar_lea.sflag [#allocation4], %s1232_s26  ;;  %s1014_s9 = scalar_lea.vmem %s1266_s29, 256 }
  0x4b   : > { %813 = vmatprep.subr.bf16.mxu0 %v933_v1  ;;  %v943_v6 = vld [vmem:[#allocation5 + $0x70] sm:$0xff]   ;;  %827 = vmatprep.mubr.bf16.mxu0 %v1249_v4  ;;  %v945_v10 = vld [vmem:[#allocation5 + $0x60] sm:$0xff]   ;;  %v938_v11 = vld [vmem:[#allocation5 + $0x8] sm:$0xff]   ;;  %p1015_p3 = scmp.ne.s32.totalorder %s1266_s29, %s1014_s9  ;;  %p1332_p10 = scmp.ne.s32.totalorder %s1326_s6, 0 }
  0x4c   : > { %832 = vmatpush3.bf16.msra.mxu1 %v942_v5  ;;  %v937_v9 = vld [vmem:[#allocation5 + $0x10] sm:$0xff]   ;;  %v946_v12 = vld [vmem:[#allocation5 + $0x58] sm:$0xff]   ;;  %v939_v13 = vld [vmem:[#allocation5] sm:$0xff]   ;;  %v230_v25 = vsub.s32 0, %v229_v24  ;;  %v366_v45 = vsub.s32 1, %v229_v24  ;;  %v490_v61 = vsub.s32 2, %v229_v24 }
  0x4d   : > { %833 = vmatprep.subr.bf16.mxu1 %v943_v6  ;;  %v1253_v14 = vld [vmem:[%s1238_s23 + $0x8] sm:$0xff]   ;;  %v947_v15 = vld [vmem:[#allocation5 + $0x50] sm:$0xff]   ;;  %v949_v17 = vld [vmem:[#allocation5 + $0x40] sm:$0xff]   ;;  %p1016_p7 = pnand %p1015_p3, %p1332_p10  ;;  %s1088_s16 = smov [#allocation7]  }
  0x4e   : > { %814 = vmatpush3.bf16.msra.mxu0 %v933_v1  ;;  %v948_v16 = vld [vmem:[#allocation5 + $0x48] sm:$0xff]   ;;  %v950_v18 = vld [vmem:[#allocation5 + $0xb8] sm:$0xff]   ;;  %v951_v19 = vld [vmem:[#allocation5 + $0xb0] sm:$0xff]   ;;  %v591_v1 = vunpack.c.l.bf16 %v1253_v14  ;;  %s1018_s7 = sshll.u32 %s1088_s16, 4  ;;  %s1019_s7 = int_to_ptr.vmem [resolvable:$false] %s1018_s7 }
  0x4f   : > { %815 = vmatprep.subr.bf16.mxu0 %v934_v2  ;;  %v952_v20 = vld [vmem:[#allocation5 + $0xa8] sm:$0xff]   ;;  %v953_v21 = vld [vmem:[#allocation5 + $0xa0] sm:$0xff]   ;;  %v954_v22 = vld [vmem:[#allocation5 + $0x98] sm:$0xff]   ;;  %p1017_p9 = pneg %p1016_p7  ;;  %s1020_s10 = scalar_lea.vmem %s1019_s7, 512 }
  0x50   : > { %834 = vmatpush3.bf16.msra.mxu1 %v943_v6  ;;  %v211_v26 = vld [vmem:[%s1315_s2] sm:$0x7]  ;;  %v955_v42 = vld [vmem:[#allocation5 + $0x90] sm:$0xff]   ;;  %v956_v43 = vld [vmem:[#allocation5 + $0x88] sm:$0xff]   ;;  %v592_v6 = vunpack.c.h.bf16 %v1253_v14  ;;  %p1021_p11 = scmp.lt.s32.totalorder %s1266_s29, %s1019_s7  ;;  %p1022_p12 = scmp.lt.s32.totalorder %s1020_s10, %s1014_s9 }
  0x51   : > { %835 = vmatprep.subr.bf16.mxu1 %v944_v8  ;;  %v231_v28 = vrot.slane %v211_v26, %v230_v25  ;;  %v957_v44 = vld [vmem:[#allocation5 + $0x80] sm:$0xff]   ;;  %v367_v47 = vrot.slane %v211_v26, %v366_v45  ;;  %v491_v62 = vrot.slane %v211_v26, %v490_v61 }
  0x52   : > { %816 = vmatpush3.bf16.msra.mxu0 %v934_v2  ;;  %p1023_p13 = por %p1022_p12, %p1021_p11 }
  0x53   : > { %817 = vmatprep.subr.bf16.mxu0 %v935_v3 }
  0x54   : > { %836 = vmatpush3.bf16.msra.mxu1 %v944_v8  ;;  %v590_v8 = vunpack.c.h.bf16 %v1249_v4  ;;  %p1024_p0 = pnand %p1023_p13, %p1017_p9 }
  0x55   : > { %837 = vmatprep.subr.bf16.mxu1 %v945_v10 }
  0x56   : > { %818 = vmatpush3.bf16.msra.mxu0 %v935_v3  ;;  %v589_v3 = vunpack.c.l.bf16 %v1249_v4 }
  0x57   : > { %819 = vmatprep.subr.bf16.mxu0 %v936_v7 }
  0x58   : > { %838 = vmatpush3.bf16.msra.mxu1 %v945_v10 }
  0x59   : > { %839 = vmatprep.subr.bf16.mxu1 %v946_v12 }
  0x5a   : > { %820 = vmatpush3.bf16.msra.mxu0 %v936_v7 }
  0x5b   : > { %821 = vmatprep.subr.bf16.mxu0 %v937_v9 }
  0x5c   : > { %840 = vmatpush3.bf16.msra.mxu1 %v946_v12 }
  0x5d   : > { %841 = vmatprep.subr.bf16.mxu1 %v947_v15 }
  0x5e   : > { %822 = vmatpush3.bf16.msra.mxu0 %v937_v9 }
  0x5f   : > { %823 = vmatprep.subr.bf16.mxu0 %v938_v11 }
  0x60   : > { %842 = vmatpush3.bf16.msra.mxu1 %v947_v15 }
  0x61   : > { %843 = vmatprep.subr.bf16.mxu1 %v948_v16 }
  0x62   : > { %824 = vmatpush3.bf16.msra.mxu0 %v938_v11 }
  0x63   : > { %825 = vmatprep.subr.bf16.mxu0 %v939_v13 }
  0x64   : > { %844 = vmatpush3.bf16.msra.mxu1 %v948_v16 }
  0x65   : > { %845 = vmatprep.subr.bf16.mxu1 %v949_v17 }
  0x66   : > { %826 = vmatpush3.bf16.msra.mxu0 %v939_v13 }
  0x67   : > { %851 = vmatprep.subr.bf16.mxu0 %v950_v18 }
  0x68   : > { %846 = vmatpush3.bf16.msra.mxu1 %v949_v17 }
  0x69   : > { %828 = vmatmul.mubr.bf16.vlgmr.msra.gmra.mxu0 %v1253_v14 }
  0x6a   : > { %852 = vmatpush3.bf16.msra.mxu0 %v950_v18 }
  0x6b   : > { %853 = vmatprep.subr.bf16.mxu0 %v951_v19 }
  0x6e   : > { %854 = vmatpush3.bf16.msra.mxu0 %v951_v19 }
  0x6f   : > { %855 = vmatprep.subr.bf16.mxu0 %v952_v20 }
  0x72   : > { %856 = vmatpush3.bf16.msra.mxu0 %v952_v20 }
  0x73   : > { %857 = vmatprep.subr.bf16.mxu0 %v953_v21 }
  0x76   : > { %858 = vmatpush3.bf16.msra.mxu0 %v953_v21 }
  0x77   : > { %859 = vmatprep.subr.bf16.mxu0 %v954_v22 }
  0x7a   : > { %860 = vmatpush3.bf16.msra.mxu0 %v954_v22 }
  0x7b   : > { %861 = vmatprep.subr.bf16.mxu0 %v955_v42 }
  0x7e   : > { %862 = vmatpush3.bf16.msra.mxu0 %v955_v42 }
  0x7f   : > { %863 = vmatprep.subr.bf16.mxu0 %v956_v43 }
  0x82   : > { %864 = vmatpush3.bf16.msra.mxu0 %v956_v43 }
  0x83   : > { %865 = vmatprep.subr.bf16.mxu0 %v957_v44 }
  0x86   : > { %866 = vmatpush3.bf16.msra.mxu0 %v957_v44 }
 0x129   : > { %v829_v27 = vpop.f32.mrf.mxu0 }
 0x12a   : > { %v335_v33 = vadd.f32 %v829_v27, %v231_v28 }
 0x12b   : > { %v326_v29 = vpop.f32.mrf.mxu0 }
 0x12c   : > { %v327_v31 = vadd.f32 %v326_v29, %v231_v28  ;;  %v343_v39 = vmax.f32 %v335_v33, 0.0 }
 0x12d   : > { %v830_v30 = vpop.f32.mrf.mxu0 }
 0x12e   : > { %v338_v32 = vadd.f32 %v830_v30, %v231_v28  ;;  %v341_v37 = vmax.f32 %v327_v31, 0.0 }
 0x12f   : > { %v329_v34 = vpop.f32.mrf.mxu0 }
 0x130   : > { %v330_v35 = vadd.f32 %v329_v34, %v231_v28  ;;  %v344_v36 = vmax.f32 %v338_v32, 0.0 }
 0x132   : > { %v342_v38 = vmax.f32 %v330_v35, 0.0  ;;  %v346_v41 = vpack.c.bf16 %v344_v36, %v343_v39 }
 0x134   : > { %v345_v40 = vpack.c.bf16 %v342_v38, %v341_v37 }
 0x136   : > { %847 = vmatprep.mubr.bf16.mxu1 %v345_v40 }
 0x137   : > { %848 = vmatmul.mubr.bf16.vlgmr.msra.gmra.mxu1 %v346_v41 }
 0x1f7   : > { %v849_v46 = vpop.f32.mrf.mxu1 }
 0x1f8   : > { %v459_v52 = vadd.f32 %v849_v46, %v367_v47 }
 0x1f9   : > { %v450_v48 = vpop.f32.mrf.mxu1 }
 0x1fa   : > { %v451_v50 = vadd.f32 %v450_v48, %v367_v47  ;;  %v467_v58 = vmax.f32 %v459_v52, 0.0 }
 0x1fb   : > { %v850_v49 = vpop.f32.mrf.mxu1 }
 0x1fc   : > { %v462_v51 = vadd.f32 %v850_v49, %v367_v47  ;;  %v465_v56 = vmax.f32 %v451_v50, 0.0 }
 0x1fd   : > { %v453_v53 = vpop.f32.mrf.mxu1 }
 0x1fe   : > { %v454_v54 = vadd.f32 %v453_v53, %v367_v47  ;;  %v468_v55 = vmax.f32 %v462_v51, 0.0 }
 0x200   : > { %v466_v57 = vmax.f32 %v454_v54, 0.0  ;;  %v470_v60 = vpack.c.bf16 %v468_v55, %v467_v58 }
 0x202   : > { %v469_v59 = vpack.c.bf16 %v466_v57, %v465_v56 }
 0x204   : > { %867 = vmatprep.mubr.bf16.mxu0 %v469_v59 }
 0x205   : > { %868 = vmatmul.mubr.bf16.vlgmr.msra.gmra.mxu0 %v470_v60 }
 0x2c5   : > { %v869_v63 = vpop.f32.mrf.mxu0 }
 0x2c6   : > { %v583_v0 = vadd.f32 %v869_v63, %v491_v62 }
 0x2c7   : > { %v574_v2 = vpop.f32.mrf.mxu0 }
 0x2c8   : > { %v575_v5 = vadd.f32 %v574_v2, %v491_v62  ;;  %v595_v9 = vadd.f32 %v591_v1, %v583_v0 }
 0x2c9   : > { %v870_v7 = vpop.f32.mrf.mxu0 }
 0x2ca   : > { %v586_v10 = vadd.f32 %v870_v7, %v491_v62  ;;  %v593_v12 = vadd.f32 %v589_v3, %v575_v5  ;;  %v599_v16 = vmax.f32 %v595_v9, 0.0 }
 0x2cb   : > { %v577_v11 = vpop.f32.mrf.mxu0 }
 0x2cc   : > { %v596_v13 = vadd.f32 %v592_v6, %v586_v10  ;;  %v578_v15 = vadd.f32 %v577_v11, %v491_v62  ;;  %v597_v19 = vmax.f32 %v593_v12, 0.0 }
 0x2ce   : > { %v600_v17 = vmax.f32 %v596_v13, 0.0  ;;  %v594_v18 = vadd.f32 %v590_v8, %v578_v15 }
 0x2d0   : > { %v778_v14 = vpack.c.bf16 %v600_v17, %v599_v16  ;;  %v598_v4 = vmax.f32 %v594_v18, 0.0 }
 0x2d2   : > { %780 = vst [vmem:[%s203_s28 + $0x8] sm:$0xff] %v778_v14   ;;  %v773_v20 = vpack.c.bf16 %v598_v4, %v597_v19 }
 0x2d4   : > { %774 = vst [vmem:[%s203_s28] sm:$0xff] %v773_v20  }
 0x2d5   : > { %1027 = shalt.err (!%p1024_p0)
}
 0x2d6   : > { %s1028_s11 = scalar_lea.hbm %s1271_s4, 256  ;;  %s1032_s30 = scalar_lea.hbm %s1316_s3, 1024 }
 0x2d7   : > { %p1029_p5 = scmp.ne.s32.totalorder %s1271_s4, %s1028_s11  ;;  %p1033_p4 = scmp.lt.s32.totalorder %s1271_s4, %s1316_s3 }
 0x2d8   : > { %p1034_p6 = scmp.lt.s32.totalorder %s1032_s30, %s1028_s11 }
 0x2d9   : > { %p1030_p2 = pnand %p1029_p5, %p1332_p10 }
 0x2da   : > { %p1035_p8 = por %p1034_p6, %p1033_p4 }
 0x2db   : > { %p1031_p1 = pneg %p1030_p2 }
 0x2dd   : > { %p1036_p3 = pnand %p1035_p8, %p1031_p1 }
 0x2df   : > { %1039 = shalt.err (!%p1036_p3)
}
 0x2e0   : > { %s1089_s20 = smov 64   ;;  %s1090_s28 = smov 4  }
 0x2e1   : > { %877 = dma.vmem_to_hbm [thread:$0]  (%p1332_p10), %s1266_s29, 256, %s1271_s4, %s622_s8, %s1089_s20, %s1089_s20, %s1090_s28  }
 0x2e2 PF: > { %p894_p7 = scmp.ge.s32.totalorder %s1082_s15, 2  ;;  %s650_s17 = sand.u32 1, %s1070_s12  }
 0x2e3   : > { %p1333_p9 = scmp.ne.s32.totalorder %s1322_s19, 0  ;;  %s651_s22 = scalar_lea.sflag [#allocation4], %s650_s17 }
 0x2e5   : > { %p888_p11 = pnand %p894_p7, %p1333_p9 }
 0x2e7   : > { %p889_p12 = pneg %p888_p11 }
 0x2e9   : > { %1065 = dma.done.wait (%p889_p12), %s651_s22, 256  }
 0x2ea   : > { %1067 = vsyncadd (%p889_p12), %s651_s22, 4294967040  ;;  %p17_p13 = scmp.ge.s32.totalorder %s1164_s24, 6   ;;  %s1334_s12 = smov %s1074_s13 }
 0x2eb   : > { %s1335_s13 = smov %s1078_s14  ;;  %s1336_s14 = smov %s1184_s5 }
 0x2ec   : > { %s1337_s15 = smov %s1164_s24  ;;  %19 = sbr.rel (!%p17_p13) target bundleno = 6 (0x6), region = 83 }
 0x2f1   :  { %656 = vsyncpa [#allocation3], 1 }
 0x2f2   :  { %658 = vsyncpa [#allocation3 + $0x1], 1 }
 0x2f3   :  { %659 = vsyncpa [#allocation6], 1 }
 0x2f4   :  { %660 = vsyncpa [#allocation4], 1 }
 0x2f5   :  { %662 = vsyncpa [#allocation4 + $0x1], 1 }

</bundles_post_ra>
